<compile_context>
chip_gen: v7x
topology: tpu7x:2x2x1
jax: 0.10.0
libtpu: 0.0.40
codegen_flags: <defaults>
</compile_context>

<pallas_src>
import functools
import math

import jax
import jax.numpy as jnp
import numpy as np
from jax.experimental import pallas as pl
from jax.experimental.pallas import tpu as pltpu

LANES = 128
CHUNK_ROWS = 512          # rows per fused inner-loop chunk (512*128*4B = 256 KiB)
MAX_BLOCK_ROWS = 8192     # 8192*128*4B = 4 MiB f32 per input per pipeline buffer
NUM_CORES_HINT = 2        # balance blocks across v7x's 2 TensorCores


def _round_up(a, m):
    return -(-a // m) * m


def _dice_partials_kernel(x_ref, t_ref, out_ref, *, block_rows, chunk_rows,
                          nfull, rem, rows_total, loss_type, oob):
    """Per-block partial sums, written as raw (8,128) f32 accumulators.

    out_ref block layout (nq*8, 128):
      rows  0: 8  -> accumulator of x*t
      rows  8:16  -> accumulator of x + t
      rows 16:24  -> accumulator of BCE-with-logits terms (loss_type == 2 only)
    """
    nq = 3 if loss_type == 2 else 2

    def chunk_partials(r0, size, masked):
        x = x_ref[pl.ds(r0, size), :].astype(jnp.float32)
        t = t_ref[pl.ds(r0, size), :].astype(jnp.float32)
        if masked:
            # Only out-of-bounds rows of the last block need masking.
            base = pl.program_id(0) * block_rows + r0
            row = jax.lax.broadcasted_iota(jnp.int32, (size, 1), 0)
            ok = (base + row) < rows_total
            x = jnp.where(ok, x, 0.0)
            t = jnp.where(ok, t, 0.0)
        xt = x * t

        def fold(a):  # (size, 128) -> (8, 128); pure vreg adds, no XLU per chunk
            return jnp.sum(a.reshape(size // 8, 8, LANES), axis=0)

        parts = [fold(xt), fold(x + t)]
        if loss_type == 2:
            # Numerically stable BCE-with-logits; reuses xt.
            bce = jnp.maximum(x, 0.0) - xt + jnp.log1p(jnp.exp(-jnp.abs(x)))
            if masked:
                bce = jnp.where(ok, bce, 0.0)
            parts.append(fold(bce))
        return tuple(parts)

    def run(masked):
        accs = tuple(jnp.zeros((8, LANES), jnp.float32) for _ in range(nq))
        if nfull > 0:
            def body(c, carry):
                r0 = pl.multiple_of(c * chunk_rows, chunk_rows)
                p = chunk_partials(r0, chunk_rows, masked)
                return tuple(a + b for a, b in zip(carry, p))
            accs = jax.lax.fori_loop(0, nfull, body, accs, unroll=True)
        if rem > 0:
            p = chunk_partials(nfull * chunk_rows, rem, masked)
            accs = tuple(a + b for a, b in zip(accs, p))
        for q, a in enumerate(accs):
            out_ref[pl.ds(q * 8, 8), :] = a

    if not oob:
        # Every row of every block is valid -- no mask work at all.
        run(False)
    else:
        i = pl.program_id(0)
        last = pl.num_programs(0) - 1

        @pl.when(i < last)
        def _():
            run(False)

        @pl.when(i == last)
        def _():
            run(True)


def _partial_sums_jax(x, t, loss_type):
    """Plain-JAX partials for the tiny (<128 element) tail / degenerate case."""
    x = x.astype(jnp.float32)
    t = t.astype(jnp.float32)
    inter = jnp.sum(x * t)
    total = jnp.sum(x) + jnp.sum(t)
    if loss_type == 2:
        bce = jnp.sum(jnp.maximum(x, 0.0) - x * t + jnp.log1p(jnp.exp(-jnp.abs(x))))
    else:
        bce = jnp.float32(0.0)
    return inter, total, bce


def _partial_sums_pallas(x2, t2, rows, loss_type):
    # Block sizing: an even number of near-equal blocks (v7x megacore balance),
    # each <= MAX_BLOCK_ROWS rows and a multiple of 8 (sublane granularity).
    k = -(-rows // (NUM_CORES_HINT * MAX_BLOCK_ROWS))
    br = _round_up(-(-rows // (NUM_CORES_HINT * k)), 8)
    num_blocks = -(-rows // br)
    oob = num_blocks * br > rows
    nfull, rem = divmod(br, CHUNK_ROWS)

    nq = 3 if loss_type == 2 else 2
    kernel = functools.partial(
        _dice_partials_kernel, block_rows=br, chunk_rows=CHUNK_ROWS,
        nfull=nfull, rem=rem, rows_total=rows, loss_type=loss_type, oob=oob)

    n_main = rows * LANES
    in_bytes = n_main * (jnp.dtype(x2.dtype).itemsize
                         + jnp.dtype(t2.dtype).itemsize)
    cost = pl.CostEstimate(
        flops=(4 if loss_type == 1 else 10) * n_main,
        transcendentals=(2 * n_main) if loss_type == 2 else 0,
        bytes_accessed=in_bytes + num_blocks * nq * 8 * LANES * 4,
    )

    partials = pl.pallas_call(
        kernel,
        out_shape=jax.ShapeDtypeStruct((num_blocks, nq * 8, LANES), jnp.float32),
        grid_spec=pltpu.PrefetchScalarGridSpec(
            num_scalar_prefetch=0,
            grid=(num_blocks,),
            in_specs=[pl.BlockSpec((br, LANES), lambda i: (i, 0)),
                      pl.BlockSpec((br, LANES), lambda i: (i, 0))],
            out_specs=pl.BlockSpec((None, nq * 8, LANES), lambda i: (i, 0, 0)),
        ),
        compiler_params=pltpu.CompilerParams(
            dimension_semantics=("parallel",),     # megacore split on v7x
            vmem_limit_bytes=48 * 1024 * 1024,     # safe on v5e/v6e/v7x (64 MiB)
        ),
        cost_estimate=cost,
    )(x2, t2)

    inter = jnp.sum(partials[:, 0:8, :])
    total = jnp.sum(partials[:, 8:16, :])
    bce = jnp.sum(partials[:, 16:24, :]) if loss_type == 2 else jnp.float32(0.0)
    return inter, total, bce


@functools.partial(jax.jit, static_argnames=("loss_type",))
def dice_loss_pallas(inp, target, loss_type=1):
    """Equivalent of dice_loss(type=loss_type).forward(inp, target)."""
    assert inp.shape == target.shape
    n = int(math.prod(inp.shape))

    xf = inp.reshape(-1)      # free: row-major flatten matches torch .view(-1)
    tf = target.reshape(-1)
    main = (n // LANES) * LANES
    tail = n - main
    rows = main // LANES

    inter = jnp.float32(0.0)
    total = jnp.float32(0.0)
    bce_sum = jnp.float32(0.0)

    if rows > 0:
        if tail:
            # TODO(synk): the prefix slice may materialize a copy in the rare
            # n % 128 != 0 case; typical conv shapes hit the free-reshape path.
            x2 = jax.lax.slice(xf, (0,), (main,)).reshape(rows, LANES)
            t2 = jax.lax.slice(tf, (0,), (main,)).reshape(rows, LANES)
        else:
            x2 = xf.reshape(rows, LANES)
            t2 = tf.reshape(rows, LANES)
        inter, total, bce_sum = _partial_sums_pallas(x2, t2, rows, loss_type)

    if tail:
        # <128 trailing elements folded into the scalar epilogue in plain JAX.
        x_t = jax.lax.slice(xf, (main,), (n,))
        t_t = jax.lax.slice(tf, (main,), (n,))
        ti, tt, tb = _partial_sums_jax(x_t, t_t, loss_type)
        inter = inter + ti
        total = total + tt
        bce_sum = bce_sum + tb

    smooth = jnp.float32(1.0)
    loss = 1.0 - (2.0 * inter + smooth) / (total + smooth)
    if loss_type == 2:
        loss = loss + bce_sum / jnp.float32(n)
    return loss


def _dice_loss_ref(inp, target, loss_type=1):
    """Pure-JAX reference mirroring the PyTorch module."""
    smooth = 1.0
    iflat = inp.reshape(-1).astype(jnp.float32)
    tflat = target.reshape(-1).astype(jnp.float32)
    inter = jnp.sum(iflat * tflat)
    dice = 1.0 - (2.0 * inter + smooth) / (jnp.sum(iflat) + jnp.sum(tflat) + smooth)
    if loss_type == 2:
        bce = jnp.mean(jnp.maximum(iflat, 0.0) - iflat * tflat
                       + jnp.log1p(jnp.exp(-jnp.abs(iflat))))
        dice = dice + bce
    return dice


if __name__ == "__main__":
    key = jax.random.PRNGKey(0)
    k1, k2 = jax.random.split(key)

    # NCHW activations (e.g. sigmoid probabilities) vs. a binary mask.
    x = jax.nn.sigmoid(jax.random.normal(k1, (2, 4, 16, 16), dtype=jnp.float32))
    tgt = (jax.random.uniform(k2, (2, 4, 16, 16)) > 0.5).astype(jnp.float32)

    # type=1 (module default)
    out1 = jax.block_until_ready(dice_loss_pallas(x, tgt, loss_type=1))
    ref1 = jax.block_until_ready(_dice_loss_ref(x, tgt, loss_type=1))
    assert np.allclose(np.asarray(out1), np.asarray(ref1), rtol=1e-5, atol=1e-5)

    # type=2 (dice + BCE-with-logits)
    out2 = jax.block_until_ready(dice_loss_pallas(x, tgt, loss_type=2))
    ref2 = jax.block_until_ready(_dice_loss_ref(x, tgt, loss_type=2))
    assert np.allclose(np.asarray(out2), np.asarray(ref2), rtol=1e-5, atol=1e-5)

    print("KERNEL_OK")
</pallas_src>

<mosaic_0001>
module attributes {stable_mosaic.version = 11 : i64} {
  func.func @_dice_partials_kernel(%arg0: i32, %arg1: memref<8x128xf32, #tpu.memory_space<vmem>>, %arg2: memref<8x128xf32, #tpu.memory_space<vmem>>, %arg3: memref<1x16x128xf32, #tpu.memory_space<vmem>>) attributes {dimension_semantics = [#tpu.dimension_semantics<parallel>], iteration_bounds = array<i64: 2>, scalar_prefetch = 0 : i64, scratch_operands = 0 : i64, tpu.core_type = #tpu.core_type<tc>, window_params = [{transform_indices = @transform_0, window_bounds = array<i64: 8, 128>}, {transform_indices = @transform_1, window_bounds = array<i64: 8, 128>}, {transform_indices = @transform_2, window_bounds = array<i64: 1, 16, 128>}]} {
    %cst = arith.constant 0.000000e+00 : f32
    %0 = vector.broadcast %cst : f32 to vector<8x128xf32>
    %cst_0 = arith.constant 0.000000e+00 : f32
    %1 = vector.broadcast %cst_0 : f32 to vector<8x128xf32>
    %c0 = arith.constant 0 : index
    %c0_1 = arith.constant 0 : index
    %2 = vector.load %arg1[%c0, %c0_1] : memref<8x128xf32, #tpu.memory_space<vmem>>, vector<8x128xf32>
    %c0_2 = arith.constant 0 : index
    %c0_3 = arith.constant 0 : index
    %3 = vector.load %arg2[%c0_2, %c0_3] : memref<8x128xf32, #tpu.memory_space<vmem>>, vector<8x128xf32>
    %4 = arith.mulf %2, %3 : vector<8x128xf32>
    %5 = vector.shape_cast %4 : vector<8x128xf32> to vector<1x8x128xf32>
    %cst_4 = arith.constant dense<0.000000e+00> : vector<8x128xf32>
    %6 = vector.multi_reduction <add>, %5, %cst_4 [0] : vector<1x8x128xf32> to vector<8x128xf32>
    %7 = arith.addf %2, %3 : vector<8x128xf32>
    %8 = vector.shape_cast %7 : vector<8x128xf32> to vector<1x8x128xf32>
    %cst_5 = arith.constant dense<0.000000e+00> : vector<8x128xf32>
    %9 = vector.multi_reduction <add>, %8, %cst_5 [0] : vector<1x8x128xf32> to vector<8x128xf32>
    %10 = arith.addf %0, %6 : vector<8x128xf32>
    %11 = arith.addf %1, %9 : vector<8x128xf32>
    %c0_6 = arith.constant 0 : index
    %c0_7 = arith.constant 0 : index
    %c0_8 = arith.constant 0 : index
    %12 = vector.load %arg3[%c0_6, %c0_7, %c0_8] : memref<1x16x128xf32, #tpu.memory_space<vmem>>, vector<1x8x128xf32>
    %13 = vector.shape_cast %12 : vector<1x8x128xf32> to vector<8x128xf32>
    %14 = vector.shape_cast %10 : vector<8x128xf32> to vector<1x8x128xf32>
    tpu.vector_store %arg3[%c0_6, %c0_7, %c0_8], %14 {strides = array<i32>} : memref<1x16x128xf32, #tpu.memory_space<vmem>>, vector<1x8x128xf32>,
    %c0_9 = arith.constant 0 : index
    %c8 = arith.constant 8 : index
    %c0_10 = arith.constant 0 : index
    %15 = vector.load %arg3[%c0_9, %c8, %c0_10] : memref<1x16x128xf32, #tpu.memory_space<vmem>>, vector<1x8x128xf32>
    %16 = vector.shape_cast %15 : vector<1x8x128xf32> to vector<8x128xf32>
    %17 = vector.shape_cast %11 : vector<8x128xf32> to vector<1x8x128xf32>
    tpu.vector_store %arg3[%c0_9, %c8, %c0_10], %17 {strides = array<i32>} : memref<1x16x128xf32, #tpu.memory_space<vmem>>, vector<1x8x128xf32>,
    return
  }
  func.func @transform_0(%arg0: i32) -> (i32, i32) {
    %c0_i32 = arith.constant 0 : i32
    %c0_i32_0 = arith.constant 0 : i32
    return %arg0, %c0_i32 : i32, i32
  }
  func.func @transform_1(%arg0: i32) -> (i32, i32) {
    %c0_i32 = arith.constant 0 : i32
    %c0_i32_0 = arith.constant 0 : i32
    return %arg0, %c0_i32 : i32, i32
  }
  func.func @transform_2(%arg0: i32) -> (i32, i32, i32) {
    %c0_i32 = arith.constant 0 : i32
    %c0_i32_0 = arith.constant 0 : i32
    %c0_i32_1 = arith.constant 0 : i32
    return %arg0, %c0_i32, %c0_i32_0 : i32, i32, i32
  }
}

</mosaic_0001>

<bundles_post_ra>
// kernel: dice_loss_pallas.1
= control target key start
LH: loop header
LB: loop body
LE: loop exit
PB: predicated region body
PF: predicated region fallthrough
CT: control target
= control target key end

     0   :  { %s259_s9 = smov 0   ;;  %s287_s0 = inlined_call_operand.vmem [shape: f32[16,128], index: 0, kind: input, shape index: {}]   ;;  %s288_s1 = inlined_call_operand.vmem [shape: f32[16,128], index: 1, kind: input, shape index: {}]   ;;  %s289_s2 = inlined_call_operand.vmem [shape: f32[2,16,128], index: 2, kind: output, shape index: {}]  }
   0x1 LB: > { %s235_s10 = sadd.s32 4294967295, %s261_s9   ;;  %p239_p0 = scmp.ge.s32.totalorder %s261_s9, 1  ;;  %s261_s9 = sphi %s259_s9, %s12_s9  }
   0x2   : > { %p120_p1 = scmp.lt.s32.totalorder %s261_s9, 3 }
   0x4   : > { %p121_p2 = pnand %p239_p0, %p120_p1 }
   0x5   : > { %p145_p3 = scmp.lt.s32.totalorder (!%p121_p2), %s235_s10, 1 }
   0x6   : > { %124 = sbr.rel (%p121_p2) target bundleno = 21 (0x15), region = 28 }
   0xd   : > { %s291_s10 = smov (!%p145_p3, %s235_s10), 1 }
   0xe   : > { %s240_s11 = sshll.u32 %s291_s10, 3  ;;  %s246_s12 = sshll.u32 %s291_s10, 4 }
   0xf   : > { %s148_s15 = scalar_lea.vmem %s287_s0, %s240_s11  ;;  %s152_s18 = scalar_lea.vmem %s288_s1, %s240_s11 }
  0x10   : > { %s157_s21 = scalar_lea.vmem %s289_s2, %s246_s12  ;;  %v158_v0 = vld [vmem:[%s148_s15] sm:$0xff] }
  0x11   : > { %v159_v1 = vld [vmem:[%s152_s18] sm:$0xff] }
  0x12   : > { %v160_v2 = vmul.f32 %v159_v1, %v158_v0  ;;  %v162_v3 = vadd.f32 %v159_v1, %v158_v0 }
  0x14   : > { %166 = vst [vmem:[%s157_s21] sm:$0xff] %v160_v2  ;;  %167 = vst [vmem:[%s157_s21 + $0x8] sm:$0xff] %v162_v3 }
  0x15 PF: > { %s12_s9 = sadd.s32 1, %s261_s9  }
  0x16   : > { %p9_p4 = scmp.ge.s32.totalorder %s12_s9, 4  }
  0x18   :  { %11 = sbr.rel (!%p9_p4) target bundleno = 1 (0x1), region = 61 }

</bundles_post_ra>
